<compile_context>
chip_gen: v5e
topology: v5e:2x2
jax: 0.10.0
libtpu: 0.0.40
codegen_flags: <defaults>
</compile_context>

<pallas_src>
from functools import partial

import jax
import jax.numpy as jnp
import numpy as np
from jax import lax
from jax.experimental import pallas as pl
from jax.experimental.pallas import tpu as pltpu


def _silu(v):
    # exp and the approximate reciprocal both run on the EUP slot (keeps VALU free).
    return v * pl.reciprocal(1.0 + jnp.exp(-v), approx=True)


def trd_max_kernel(x_ref, halo_ref, wmain_ref, whalo_ref, bds_ref, benc_ref,
                   wwts_ref, bwts_ref, wdec_ref, bdec_ref, out_ref):
    mt, _ = x_ref.shape              # (image rows in tile) * W2  x  4*Cin
    w2 = halo_ref.shape[0]           # W/2 (one image row of the strided output grid)
    cout = bds_ref.shape[1]
    npad = wmain_ref.shape[1] // 8   # 128-aligned lane stride of each fused output group
    bf = jnp.bfloat16

    x0 = x_ref[...]                  # (mt, 4Cin) bf16, space-to-depth channels-last
    halo = halo_ref[...]             # (w2, 4Cin) bf16, previous image row (zeros at i==0)

    # ---- stage 1: ONE fused MXU matmul.  Lane-groups 0..3 = tap-groups of the
    #      3x3/stride-2 conv for source offsets (0,0),(-1,0),(0,-1),(-1,-1);
    #      groups 4..7 = encoder 1x1 at the 4 strided positions (block-diagonal). ------
    d = jnp.dot(x0, wmain_ref[...], preferred_element_type=jnp.float32)    # (mt, 8*npad)
    yh1 = jnp.dot(halo, whalo_ref[0], preferred_element_type=jnp.float32)  # (w2, cout)
    yh3 = jnp.dot(halo, whalo_ref[1], preferred_element_type=jnp.float32)  # (w2, cout)

    g0 = d[:, 0 * npad:0 * npad + cout]
    g1 = d[:, 1 * npad:1 * npad + cout]
    g2 = d[:, 2 * npad:2 * npad + cout]
    g3 = d[:, 3 * npad:3 * npad + cout]

    # row shifts applied to the small (mt, cout) f32 results; the halo concat offset is
    # w2 (a multiple of 8), i.e. an aligned f32 sublane operation.
    if mt > w2:
        g1s = jnp.concatenate([yh1, g1[:mt - w2, :]], axis=0)   # source row i-1
        g3s = jnp.concatenate([yh3, g3[:mt - w2, :]], axis=0)
    else:
        g1s, g3s = yh1, yh3
    j0 = (lax.broadcasted_iota(jnp.int32, (mt, 1), 0) % w2) == 0   # left padding (j==0)
    ds_acc = (g0 + g1s
              + jnp.where(j0, 0.0, pltpu.roll(g2, 1, axis=0))      # source (i  , j-1)
              + jnp.where(j0, 0.0, pltpu.roll(g3s, 1, axis=0)))    # source (i-1, j-1)
    ds_pre = _silu(ds_acc + bds_ref[...])

    # ---- encoder at the 4 strided positions, fused with the exact
    #      upsample-subtract-maxpool:  max_ab(ds - code_ab) == ds - min_ab(code_ab) ----
    benc = benc_ref[...]
    cmin = _silu(d[:, 4 * npad:4 * npad + cout] + benc)
    for p in range(5, 8):
        cmin = jnp.minimum(cmin, _silu(d[:, p * npad:p * npad + cout] + benc))
    m = ds_pre - cmin

    # ---- weights conv (on ds_pre), decoder conv (on pooled residual), residual add ---
    ds_w = _silu(jnp.dot(ds_pre.astype(bf), wwts_ref[...],
                         preferred_element_type=jnp.float32) + bwts_ref[...])
    dec = _silu(jnp.dot(m.astype(bf), wdec_ref[...],
                        preferred_element_type=jnp.float32) + bdec_ref[...])
    out_ref[...] = (dec + ds_w).astype(out_ref.dtype)


def _vmem_limit_bytes():
    """~3/4 of physical VMEM, capped at 100 MiB (~48 MiB on v7x, ~96 MiB on v5e/v6e)."""
    try:
        phys = int(getattr(pltpu.get_tpu_info(), "vmem_capacity_bytes", 64 << 20))
    except Exception:
        phys = 64 << 20
    if phys <= 0:
        phys = 64 << 20
    return int(min(max(phys * 3 // 4, 32 << 20), 100 << 20))


def _auto_tile_rows(hw2, w2, c4, npad, cout, vmem_limit, fixed_bytes, batch):
    """Flattened output rows per grid step, budgeted against scoped VMEM.

    Budgets double-buffered bf16 IO *and* the in-kernel temporaries (the (mt, 8*npad)
    f32 stage-1 result plus the f32 activation chain), so v7x's 64 MiB picks a smaller
    tile than v5e/v6e's 128 MiB instead of spilling.  Also guarantees >= 2 grid steps
    when batch == 1 so both v7x TensorCores get work.
    """
    bytes_per_row = 6 * c4 + 32 * npad + 60 * cout
    budget = max(vmem_limit - fixed_bytes, vmem_limit // 8)
    target = max(w2, (budget * 85 // 100) // max(bytes_per_row, 1))
    if batch == 1 and hw2 >= 2 * w2:
        target = min(target, hw2 // 2)
    target = min(target, hw2)
    mt = max(w2, (target // w2) * w2)
    while mt > w2 and hw2 % mt:
        mt -= w2
    return mt


@partial(jax.jit, static_argnames=("spatial_tile_rows",))
def trd_max_pallas(x_nchw, wenc, benc, wds, bds, wwts, bwts, wdec, bdec,
                   spatial_tile_rows=None):
    N, Cin, H, W = x_nchw.shape
    Cout = wenc.shape[1]
    assert H % 2 == 0 and W % 2 == 0
    H2, W2 = H // 2, W // 2
    HW2, C4 = H2 * W2, 4 * Cin
    assert W2 % 8 == 0, "this kernel assumes W/2 is a multiple of the 8-sublane tile"

    bf = jnp.bfloat16
    Np = ((Cout + 127) // 128) * 128      # 128-aligned group stride in the fused matmul

    vmem_limit = _vmem_limit_bytes()
    # fixed (tile-independent) VMEM: double-buffered bf16 weights + halo + biases
    fixed_bytes = (2 * 2 * (C4 * 8 * Np + 2 * C4 * Cout + 2 * Cout * Cout + W2 * C4)
                   + 4 * 2 * 4 * Cout + (1 << 20))
    mt = spatial_tile_rows or _auto_tile_rows(HW2, W2, C4, Np, Cout, vmem_limit,
                                              fixed_bytes, N)
    assert mt % W2 == 0 and HW2 % mt == 0, "tile must be whole image rows dividing H/2*W/2"
    num_tiles = HW2 // mt

    # ---- single relayout pass: NCHW -> space-to-depth(2) channels-last, bf16 ---------
    #   xsc[n, i*W2 + j, (2a+b)*Cin + c] == x[n, c, 2i+a, 2j+b]
    xsc = (x_nchw.reshape(N, Cin, H2, 2, W2, 2)
           .transpose(0, 2, 4, 3, 5, 1)
           .reshape(N, HW2, C4)
           .astype(bf))

    # one-image-row halo per spatial tile (previous row; zeros for the first tile)
    x3 = xsc.reshape(N, num_tiles, mt, C4)
    halo = jnp.concatenate(
        [jnp.zeros((N, 1, W2, C4), xsc.dtype), x3[:, :-1, mt - W2:, :]], axis=1)

    # ---- weights in the kernel's fused-N block layout (BN folded, bf16 for the MXU) --
    z = jnp.zeros((Cin, Cout), jnp.float32)
    # downsample 3x3 taps grouped by the source offset that supplies them
    wg = [
        jnp.concatenate([wds[4], wds[5], wds[7], wds[8]], axis=0),  # (i  , j  )
        jnp.concatenate([z, z, wds[1], wds[2]], axis=0),            # (i-1, j  )
        jnp.concatenate([z, wds[3], z, wds[6]], axis=0),            # (i  , j-1)
        jnp.concatenate([z, z, z, wds[0]], axis=0),                 # (i-1, j-1)
    ]
    wmain = jnp.zeros((C4, 8 * Np), jnp.float32)
    for p in range(4):
        wmain = wmain.at[:, p * Np:p * Np + Cout].set(wg[p])
        # encoder 1x1 replicated block-diagonally over the 4 strided positions
        wmain = wmain.at[p * Cin:(p + 1) * Cin,
                         (4 + p) * Np:(4 + p) * Np + Cout].set(wenc)
    wmain = wmain.astype(bf)
    whalo = jnp.stack([wg[1], wg[3]]).astype(bf)    # tap-groups fed by the halo row

    out_flat = pl.pallas_call(
        trd_max_kernel,
        out_shape=jax.ShapeDtypeStruct((N, HW2, Cout), bf),
        grid=(N, num_tiles),
        in_specs=[
            pl.BlockSpec((None, mt, C4), lambda n, t: (n, t, 0)),
            pl.BlockSpec((None, None, W2, C4), lambda n, t: (n, t, 0, 0)),
            pl.BlockSpec((C4, 8 * Np), lambda n, t: (0, 0)),
            pl.BlockSpec((2, C4, Cout), lambda n, t: (0, 0, 0)),
            pl.BlockSpec((1, Cout), lambda n, t: (0, 0)),
            pl.BlockSpec((1, Cout), lambda n, t: (0, 0)),
            pl.BlockSpec((Cout, Cout), lambda n, t: (0, 0)),
            pl.BlockSpec((1, Cout), lambda n, t: (0, 0)),
            pl.BlockSpec((Cout, Cout), lambda n, t: (0, 0)),
            pl.BlockSpec((1, Cout), lambda n, t: (0, 0)),
        ],
        out_specs=pl.BlockSpec((None, mt, Cout), lambda n, t: (n, t, 0)),
        compiler_params=pltpu.CompilerParams(
            dimension_semantics=("parallel", "parallel"),
            vmem_limit_bytes=vmem_limit),
    )(xsc, halo, wmain, whalo, bds, benc,
      wwts.astype(bf), bwts, wdec.astype(bf), bdec)

    # bf16 output, bf16 transpose back to NCHW (consumers that accept channels-last can
    # use out_flat.reshape(N, H2, W2, Cout) directly and skip this pass).
    out = out_flat.reshape(N, H2, W2, Cout)
    return jnp.transpose(out, (0, 3, 1, 2))


def make_conv(key, ci, co, ksz, eps=1e-5):
    """Deterministic Conv2d(bias=False) + BatchNorm2d params with BN (eval stats) folded.

    Returns matmul-form weight ((ci,co) for 1x1, (9,ci,co) for 3x3, out-channel last)
    and a (1, co) bias.
    """
    kw_, kg, kb, km, kv = jax.random.split(key, 5)
    w = 0.2 * jax.random.normal(kw_, (co, ci, ksz, ksz), jnp.float32)   # torch layout
    gamma = 1.0 + 0.1 * jax.random.normal(kg, (co,), jnp.float32)
    beta = 0.1 * jax.random.normal(kb, (co,), jnp.float32)
    mean = 0.1 * jax.random.normal(km, (co,), jnp.float32)
    var = jnp.abs(jax.random.normal(kv, (co,), jnp.float32)) + 0.5
    scale = gamma / jnp.sqrt(var + eps)
    bias = (beta - mean * scale)[None, :]
    if ksz == 1:
        wm = jnp.transpose(w[:, :, 0, 0]) * scale[None, :]                 # (ci, co)
    else:
        wm = jnp.transpose(w, (2, 3, 1, 0)).reshape(ksz * ksz, ci, co)     # (kh*kw, ci, co)
        wm = wm * scale[None, None, :]
    return wm, bias


def reference(x_nchw, wenc, benc, wds, bds, wwts, bwts, wdec, bdec):
    """Pure-JAX f32 reference of TRD_MAX.forward (eval-mode BN, NHWC internally)."""
    x = jnp.transpose(x_nchw, (0, 2, 3, 1))
    cin = x.shape[-1]
    cout = wenc.shape[1]

    def conv1x1(t, w, b):
        s = jnp.einsum('nhwc,cd->nhwd', t, w) + b.reshape(1, 1, 1, -1)
        return s * jax.nn.sigmoid(s)

    code_in = conv1x1(x, wenc, benc)
    ds_pre = lax.conv_general_dilated(
        x, wds.reshape(3, 3, cin, cout), window_strides=(2, 2),
        padding=((1, 1), (1, 1)), dimension_numbers=('NHWC', 'HWIO', 'NHWC'))
    ds_pre = ds_pre + bds.reshape(1, 1, 1, -1)
    ds_pre = ds_pre * jax.nn.sigmoid(ds_pre)
    up = jnp.repeat(jnp.repeat(ds_pre, 2, axis=1), 2, axis=2)
    ds_w = conv1x1(ds_pre, wwts, bwts)
    res = up - code_in
    pooled = lax.reduce_window(res, -jnp.inf, lax.max,
                               (1, 2, 2, 1), (1, 2, 2, 1), 'VALID')
    out = conv1x1(pooled, wdec, bdec) + ds_w
    return jnp.transpose(out, (0, 3, 1, 2))


if __name__ == "__main__":
    key = jax.random.PRNGKey(0)
    kx, kp = jax.random.split(key)
    N, Cin, Cout, H, W = 2, 4, 8, 16, 16

    x = jax.random.normal(kx, (N, Cin, H, W), jnp.float32)

    k1, k2, k3, k4 = jax.random.split(kp, 4)
    wenc, benc = make_conv(k1, Cin, Cout, 1)    # encoder (1x1)
    wds, bds = make_conv(k2, Cin, Cout, 3)      # downsample (3x3, stride 2)
    wwts, bwts = make_conv(k3, Cout, Cout, 1)   # weights (1x1)
    wdec, bdec = make_conv(k4, Cout, Cout, 1)   # decoder (1x1)

    ref = np.asarray(jax.block_until_ready(
        reference(x, wenc, benc, wds, bds, wwts, bwts, wdec, bdec)))

    # run once with a multi-tile spatial grid (exercises the cross-tile halo path) and
    # once with the auto-picked tile size; bf16 matmuls/output => loosened tolerances.
    for tile_rows in (32, None):
        out = trd_max_pallas(x, wenc, benc, wds, bds, wwts, bwts, wdec, bdec,
                             spatial_tile_rows=tile_rows)
        out = np.asarray(jax.block_until_ready(out)).astype(np.float32)
        np.testing.assert_allclose(out, ref, rtol=8e-2, atol=8e-2)

    print("KERNEL_OK")
</pallas_src>

<mosaic_0001>
module attributes {stable_mosaic.version = 11 : i64} {
  func.func @trd_max_kernel(%arg0: i32, %arg1: i32, %arg2: memref<1x32x16xbf16, #tpu.memory_space<vmem>>, %arg3: memref<1x1x8x16xbf16, #tpu.memory_space<vmem>>, %arg4: memref<16x1024xbf16, #tpu.memory_space<vmem>>, %arg5: memref<2x16x8xbf16, #tpu.memory_space<vmem>>, %arg6: memref<1x8xf32, #tpu.memory_space<vmem>>, %arg7: memref<1x8xf32, #tpu.memory_space<vmem>>, %arg8: memref<8x8xbf16, #tpu.memory_space<vmem>>, %arg9: memref<1x8xf32, #tpu.memory_space<vmem>>, %arg10: memref<8x8xbf16, #tpu.memory_space<vmem>>, %arg11: memref<1x8xf32, #tpu.memory_space<vmem>>, %arg12: memref<1x32x8xbf16, #tpu.memory_space<vmem>>) attributes {dimension_semantics = [#tpu.dimension_semantics<parallel>, #tpu.dimension_semantics<parallel>], iteration_bounds = array<i64: 2, 2>, scalar_prefetch = 0 : i64, scratch_operands = 0 : i64, tpu.core_type = #tpu.core_type<tc>, window_params = [{transform_indices = @transform_0, window_bounds = array<i64: 1, 32, 16>}, {transform_indices = @transform_1, window_bounds = array<i64: 1, 1, 8, 16>}, {pipeline_mode = #tpu.pipeline_mode<synchronous>, transform_indices = @transform_2, window_bounds = array<i64: 16, 1024>}, {pipeline_mode = #tpu.pipeline_mode<synchronous>, transform_indices = @transform_3, window_bounds = array<i64: 2, 16, 8>}, {pipeline_mode = #tpu.pipeline_mode<synchronous>, transform_indices = @transform_4, window_bounds = array<i64: 1, 8>}, {pipeline_mode = #tpu.pipeline_mode<synchronous>, transform_indices = @transform_5, window_bounds = array<i64: 1, 8>}, {pipeline_mode = #tpu.pipeline_mode<synchronous>, transform_indices = @transform_6, window_bounds = array<i64: 8, 8>}, {pipeline_mode = #tpu.pipeline_mode<synchronous>, transform_indices = @transform_7, window_bounds = array<i64: 1, 8>}, {pipeline_mode = #tpu.pipeline_mode<synchronous>, transform_indices = @transform_8, window_bounds = array<i64: 8, 8>}, {pipeline_mode = #tpu.pipeline_mode<synchronous>, transform_indices = @transform_9, window_bounds = array<i64: 1, 8>}, {transform_indices = @transform_10, window_bounds = array<i64: 1, 32, 8>}]} {
    %c0 = arith.constant 0 : index
    %c0_0 = arith.constant 0 : index
    %c0_1 = arith.constant 0 : index
    %0 = vector.load %arg2[%c0, %c0_0, %c0_1] : memref<1x32x16xbf16, #tpu.memory_space<vmem>>, vector<1x32x16xbf16>
    %1 = vector.shape_cast %0 : vector<1x32x16xbf16> to vector<32x16xbf16>
    %c0_2 = arith.constant 0 : index
    %c0_3 = arith.constant 0 : index
    %c0_4 = arith.constant 0 : index
    %c0_5 = arith.constant 0 : index
    %2 = vector.load %arg3[%c0_2, %c0_3, %c0_4, %c0_5] : memref<1x1x8x16xbf16, #tpu.memory_space<vmem>>, vector<1x1x8x16xbf16>
    %3 = vector.shape_cast %2 : vector<1x1x8x16xbf16> to vector<8x16xbf16>
    %c0_6 = arith.constant 0 : index
    %c0_7 = arith.constant 0 : index
    %4 = vector.load %arg4[%c0_6, %c0_7] : memref<16x1024xbf16, #tpu.memory_space<vmem>>, vector<16x1024xbf16>
    %cst = arith.constant dense<0.000000e+00> : vector<32x1024xf32>
    %5 = tpu.matmul %1, %4, %cst {dimension_numbers = #tpu.dot_dimension_numbers<[1], [0], [0], [1], [0, 0, 1, 1], [], []>} : vector<32x16xbf16>, vector<16x1024xbf16>, vector<32x1024xf32> -> vector<32x1024xf32>
    %c0_8 = arith.constant 0 : index
    %c0_9 = arith.constant 0 : index
    %c0_10 = arith.constant 0 : index
    %6 = vector.load %arg5[%c0_8, %c0_9, %c0_10] : memref<2x16x8xbf16, #tpu.memory_space<vmem>>, vector<1x16x8xbf16>
    %7 = vector.shape_cast %6 : vector<1x16x8xbf16> to vector<16x8xbf16>
    %cst_11 = arith.constant dense<0.000000e+00> : vector<8x8xf32>
    %8 = tpu.matmul %3, %7, %cst_11 {dimension_numbers = #tpu.dot_dimension_numbers<[1], [0], [0], [1], [0, 0, 1, 1], [], []>} : vector<8x16xbf16>, vector<16x8xbf16>, vector<8x8xf32> -> vector<8x8xf32>
    %c1 = arith.constant 1 : index
    %c0_12 = arith.constant 0 : index
    %c0_13 = arith.constant 0 : index
    %9 = vector.load %arg5[%c1, %c0_12, %c0_13] : memref<2x16x8xbf16, #tpu.memory_space<vmem>>, vector<1x16x8xbf16>
    %10 = vector.shape_cast %9 : vector<1x16x8xbf16> to vector<16x8xbf16>
    %cst_14 = arith.constant dense<0.000000e+00> : vector<8x8xf32>
    %11 = tpu.matmul %3, %10, %cst_14 {dimension_numbers = #tpu.dot_dimension_numbers<[1], [0], [0], [1], [0, 0, 1, 1], [], []>} : vector<8x16xbf16>, vector<16x8xbf16>, vector<8x8xf32> -> vector<8x8xf32>
    %12 = vector.extract_strided_slice %5 {offsets = [0, 0], sizes = [32, 8], strides = [1, 1]} : vector<32x1024xf32> to vector<32x8xf32>
    %13 = vector.extract_strided_slice %5 {offsets = [0, 128], sizes = [32, 8], strides = [1, 1]} : vector<32x1024xf32> to vector<32x8xf32>
    %14 = vector.extract_strided_slice %5 {offsets = [0, 256], sizes = [32, 8], strides = [1, 1]} : vector<32x1024xf32> to vector<32x8xf32>
    %15 = vector.extract_strided_slice %5 {offsets = [0, 384], sizes = [32, 8], strides = [1, 1]} : vector<32x1024xf32> to vector<32x8xf32>
    %16 = vector.extract_strided_slice %13 {offsets = [0, 0], sizes = [24, 8], strides = [1, 1]} : vector<32x8xf32> to vector<24x8xf32>
    %17 = tpu.concatenate %8, %16 in 0 : vector<8x8xf32>, vector<24x8xf32> -> vector<32x8xf32>
    %18 = vector.extract_strided_slice %15 {offsets = [0, 0], sizes = [24, 8], strides = [1, 1]} : vector<32x8xf32> to vector<24x8xf32>
    %19 = tpu.concatenate %11, %18 in 0 : vector<8x8xf32>, vector<24x8xf32> -> vector<32x8xf32>
    %20 = tpu.iota {dimensions = array<i32: 0>} : vector<32x1xi32>
    %c8_i32 = arith.constant 8 : i32
    %c0_i32 = arith.constant 0 : i32
    %21 = arith.cmpi eq, %c8_i32, %c0_i32 : i32
    %c1_i32 = arith.constant 1 : i32
    %22 = arith.select %21, %c1_i32, %c8_i32 : i32
    %23 = vector.broadcast %22 : i32 to vector<32x1xi32>
    %24 = arith.remsi %20, %23 : vector<32x1xi32>
    %c0_i32_15 = arith.constant 0 : i32
    %25 = vector.broadcast %c0_i32_15 : i32 to vector<32x1xi32>
    %26 = arith.cmpi ne, %24, %25 : vector<32x1xi32>
    %c0_i32_16 = arith.constant 0 : i32
    %27 = vector.broadcast %c0_i32_16 : i32 to vector<32x1xi32>
    %28 = arith.cmpi slt, %24, %27 : vector<32x1xi32>
    %c0_i32_17 = arith.constant 0 : i32
    %29 = arith.cmpi slt, %22, %c0_i32_17 : i32
    %30 = vector.broadcast %29 : i1 to vector<32x1xi1>
    %31 = vector.broadcast %30 : vector<32x1xi1> to vector<32x1xi1>
    %32 = arith.xori %28, %31 : vector<32x1xi1>
    %33 = arith.andi %32, %26 : vector<32x1xi1>
    %34 = vector.broadcast %22 : i32 to vector<32x1xi32>
    %35 = arith.addi %24, %34 : vector<32x1xi32>
    %36 = arith.select %33, %35, %24 : vector<32x1xi1>, vector<32x1xi32>
    %c0_i32_18 = arith.constant 0 : i32
    %37 = vector.broadcast %c0_i32_18 : i32 to vector<32x1xi32>
    %38 = arith.cmpi eq, %36, %37 : vector<32x1xi32>
    %39 = arith.addf %12, %17 : vector<32x8xf32>
    %c1_i32_19 = arith.constant 1 : i32
    %40 = tpu.dynamic_rotate %14 by %c1_i32_19 dim 0 : vector<32x8xf32>, i32 -> vector<32x8xf32>
    %cst_20 = arith.constant 0.000000e+00 : f32
    %41 = vector.shape_cast %38 : vector<32x1xi1> to vector<32x1xi1>
    %42 = vector.broadcast %41 : vector<32x1xi1> to vector<32x8xi1>
    %43 = vector.broadcast %cst_20 : f32 to vector<32x8xf32>
    %44 = arith.select %42, %43, %40 : vector<32x8xi1>, vector<32x8xf32>
    %45 = arith.addf %39, %44 : vector<32x8xf32>
    %c1_i32_21 = arith.constant 1 : i32
    %46 = tpu.dynamic_rotate %19 by %c1_i32_21 dim 0 : vector<32x8xf32>, i32 -> vector<32x8xf32>
    %cst_22 = arith.constant 0.000000e+00 : f32
    %47 = vector.shape_cast %38 : vector<32x1xi1> to vector<32x1xi1>
    %48 = vector.broadcast %47 : vector<32x1xi1> to vector<32x8xi1>
    %49 = vector.broadcast %cst_22 : f32 to vector<32x8xf32>
    %50 = arith.select %48, %49, %46 : vector<32x8xi1>, vector<32x8xf32>
    %51 = arith.addf %45, %50 : vector<32x8xf32>
    %c0_23 = arith.constant 0 : index
    %c0_24 = arith.constant 0 : index
    %52 = vector.load %arg6[%c0_23, %c0_24] : memref<1x8xf32, #tpu.memory_space<vmem>>, vector<1x8xf32>
    %53 = vector.broadcast %52 : vector<1x8xf32> to vector<32x8xf32>
    %54 = arith.addf %51, %53 : vector<32x8xf32>
    %cst_25 = arith.constant 0.000000e+00 : f32
    %55 = vector.broadcast %cst_25 : f32 to vector<32x8xf32>
    %56 = arith.subf %55, %54 : vector<32x8xf32>
    %57 = math.exp %56 : vector<32x8xf32>
    %cst_26 = arith.constant 1.000000e+00 : f32
    %58 = vector.broadcast %cst_26 : f32 to vector<32x8xf32>
    %59 = arith.addf %58, %57 : vector<32x8xf32>
    %60 = tpu.reciprocal %59 {approx = true} : vector<32x8xf32> -> vector<32x8xf32>
    %61 = arith.mulf %54, %60 : vector<32x8xf32>
    %c0_27 = arith.constant 0 : index
    %c0_28 = arith.constant 0 : index
    %62 = vector.load %arg7[%c0_27, %c0_28] : memref<1x8xf32, #tpu.memory_space<vmem>>, vector<1x8xf32>
    %63 = vector.extract_strided_slice %5 {offsets = [0, 512], sizes = [32, 8], strides = [1, 1]} : vector<32x1024xf32> to vector<32x8xf32>
    %64 = vector.broadcast %62 : vector<1x8xf32> to vector<32x8xf32>
    %65 = arith.addf %63, %64 : vector<32x8xf32>
    %cst_29 = arith.constant 0.000000e+00 : f32
    %66 = vector.broadcast %cst_29 : f32 to vector<32x8xf32>
    %67 = arith.subf %66, %65 : vector<32x8xf32>
    %68 = math.exp %67 : vector<32x8xf32>
    %cst_30 = arith.constant 1.000000e+00 : f32
    %69 = vector.broadcast %cst_30 : f32 to vector<32x8xf32>
    %70 = arith.addf %69, %68 : vector<32x8xf32>
    %71 = tpu.reciprocal %70 {approx = true} : vector<32x8xf32> -> vector<32x8xf32>
    %72 = arith.mulf %65, %71 : vector<32x8xf32>
    %73 = vector.extract_strided_slice %5 {offsets = [0, 640], sizes = [32, 8], strides = [1, 1]} : vector<32x1024xf32> to vector<32x8xf32>
    %74 = vector.broadcast %62 : vector<1x8xf32> to vector<32x8xf32>
    %75 = arith.addf %73, %74 : vector<32x8xf32>
    %cst_31 = arith.constant 0.000000e+00 : f32
    %76 = vector.broadcast %cst_31 : f32 to vector<32x8xf32>
    %77 = arith.subf %76, %75 : vector<32x8xf32>
    %78 = math.exp %77 : vector<32x8xf32>
    %cst_32 = arith.constant 1.000000e+00 : f32
    %79 = vector.broadcast %cst_32 : f32 to vector<32x8xf32>
    %80 = arith.addf %79, %78 : vector<32x8xf32>
    %81 = tpu.reciprocal %80 {approx = true} : vector<32x8xf32> -> vector<32x8xf32>
    %82 = arith.mulf %75, %81 : vector<32x8xf32>
    %83 = arith.minimumf %72, %82 : vector<32x8xf32>
    %84 = vector.extract_strided_slice %5 {offsets = [0, 768], sizes = [32, 8], strides = [1, 1]} : vector<32x1024xf32> to vector<32x8xf32>
    %85 = vector.broadcast %62 : vector<1x8xf32> to vector<32x8xf32>
    %86 = arith.addf %84, %85 : vector<32x8xf32>
    %cst_33 = arith.constant 0.000000e+00 : f32
    %87 = vector.broadcast %cst_33 : f32 to vector<32x8xf32>
    %88 = arith.subf %87, %86 : vector<32x8xf32>
    %89 = math.exp %88 : vector<32x8xf32>
    %cst_34 = arith.constant 1.000000e+00 : f32
    %90 = vector.broadcast %cst_34 : f32 to vector<32x8xf32>
    %91 = arith.addf %90, %89 : vector<32x8xf32>
    %92 = tpu.reciprocal %91 {approx = true} : vector<32x8xf32> -> vector<32x8xf32>
    %93 = arith.mulf %86, %92 : vector<32x8xf32>
    %94 = arith.minimumf %83, %93 : vector<32x8xf32>
    %95 = vector.extract_strided_slice %5 {offsets = [0, 896], sizes = [32, 8], strides = [1, 1]} : vector<32x1024xf32> to vector<32x8xf32>
    %96 = vector.broadcast %62 : vector<1x8xf32> to vector<32x8xf32>
    %97 = arith.addf %95, %96 : vector<32x8xf32>
    %cst_35 = arith.constant 0.000000e+00 : f32
    %98 = vector.broadcast %cst_35 : f32 to vector<32x8xf32>
    %99 = arith.subf %98, %97 : vector<32x8xf32>
    %100 = math.exp %99 : vector<32x8xf32>
    %cst_36 = arith.constant 1.000000e+00 : f32
    %101 = vector.broadcast %cst_36 : f32 to vector<32x8xf32>
    %102 = arith.addf %101, %100 : vector<32x8xf32>
    %103 = tpu.reciprocal %102 {approx = true} : vector<32x8xf32> -> vector<32x8xf32>
    %104 = arith.mulf %97, %103 : vector<32x8xf32>
    %105 = arith.minimumf %94, %104 : vector<32x8xf32>
    %106 = arith.subf %61, %105 : vector<32x8xf32>
    %107 = arith.truncf %61 : vector<32x8xf32> to vector<32x8xbf16>
    %c0_37 = arith.constant 0 : index
    %c0_38 = arith.constant 0 : index
    %108 = vector.load %arg8[%c0_37, %c0_38] : memref<8x8xbf16, #tpu.memory_space<vmem>>, vector<8x8xbf16>
    %cst_39 = arith.constant dense<0.000000e+00> : vector<32x8xf32>
    %109 = tpu.matmul %107, %108, %cst_39 {dimension_numbers = #tpu.dot_dimension_numbers<[1], [0], [0], [1], [0, 0, 1, 1], [], []>} : vector<32x8xbf16>, vector<8x8xbf16>, vector<32x8xf32> -> vector<32x8xf32>
    %c0_40 = arith.constant 0 : index
    %c0_41 = arith.constant 0 : index
    %110 = vector.load %arg9[%c0_40, %c0_41] : memref<1x8xf32, #tpu.memory_space<vmem>>, vector<1x8xf32>
    %111 = vector.broadcast %110 : vector<1x8xf32> to vector<32x8xf32>
    %112 = arith.addf %109, %111 : vector<32x8xf32>
    %cst_42 = arith.constant 0.000000e+00 : f32
    %113 = vector.broadcast %cst_42 : f32 to vector<32x8xf32>
    %114 = arith.subf %113, %112 : vector<32x8xf32>
    %115 = math.exp %114 : vector<32x8xf32>
    %cst_43 = arith.constant 1.000000e+00 : f32
    %116 = vector.broadcast %cst_43 : f32 to vector<32x8xf32>
    %117 = arith.addf %116, %115 : vector<32x8xf32>
    %118 = tpu.reciprocal %117 {approx = true} : vector<32x8xf32> -> vector<32x8xf32>
    %119 = arith.mulf %112, %118 : vector<32x8xf32>
    %120 = arith.truncf %106 : vector<32x8xf32> to vector<32x8xbf16>
    %c0_44 = arith.constant 0 : index
    %c0_45 = arith.constant 0 : index
    %121 = vector.load %arg10[%c0_44, %c0_45] : memref<8x8xbf16, #tpu.memory_space<vmem>>, vector<8x8xbf16>
    %cst_46 = arith.constant dense<0.000000e+00> : vector<32x8xf32>
    %122 = tpu.matmul %120, %121, %cst_46 {dimension_numbers = #tpu.dot_dimension_numbers<[1], [0], [0], [1], [0, 0, 1, 1], [], []>} : vector<32x8xbf16>, vector<8x8xbf16>, vector<32x8xf32> -> vector<32x8xf32>
    %c0_47 = arith.constant 0 : index
    %c0_48 = arith.constant 0 : index
    %123 = vector.load %arg11[%c0_47, %c0_48] : memref<1x8xf32, #tpu.memory_space<vmem>>, vector<1x8xf32>
    %124 = vector.broadcast %123 : vector<1x8xf32> to vector<32x8xf32>
    %125 = arith.addf %122, %124 : vector<32x8xf32>
    %cst_49 = arith.constant 0.000000e+00 : f32
    %126 = vector.broadcast %cst_49 : f32 to vector<32x8xf32>
    %127 = arith.subf %126, %125 : vector<32x8xf32>
    %128 = math.exp %127 : vector<32x8xf32>
    %cst_50 = arith.constant 1.000000e+00 : f32
    %129 = vector.broadcast %cst_50 : f32 to vector<32x8xf32>
    %130 = arith.addf %129, %128 : vector<32x8xf32>
    %131 = tpu.reciprocal %130 {approx = true} : vector<32x8xf32> -> vector<32x8xf32>
    %132 = arith.mulf %125, %131 : vector<32x8xf32>
    %133 = arith.addf %132, %119 : vector<32x8xf32>
    %134 = arith.truncf %133 : vector<32x8xf32> to vector<32x8xbf16>
    %c0_51 = arith.constant 0 : index
    %c0_52 = arith.constant 0 : index
    %c0_53 = arith.constant 0 : index
    %135 = vector.load %arg12[%c0_51, %c0_52, %c0_53] : memref<1x32x8xbf16, #tpu.memory_space<vmem>>, vector<1x32x8xbf16>
    %136 = vector.shape_cast %135 : vector<1x32x8xbf16> to vector<32x8xbf16>
    %137 = vector.shape_cast %134 : vector<32x8xbf16> to vector<1x32x8xbf16>
    tpu.vector_store %arg12[%c0_51, %c0_52, %c0_53], %137 {strides = array<i32>} : memref<1x32x8xbf16, #tpu.memory_space<vmem>>, vector<1x32x8xbf16>,
    return
  }
  func.func @transform_0(%arg0: i32, %arg1: i32) -> (i32, i32, i32) {
    %c0_i32 = arith.constant 0 : i32
    %c0_i32_0 = arith.constant 0 : i32
    return %arg0, %arg1, %c0_i32 : i32, i32, i32
  }
  func.func @transform_1(%arg0: i32, %arg1: i32) -> (i32, i32, i32, i32) {
    %c0_i32 = arith.constant 0 : i32
    %c0_i32_0 = arith.constant 0 : i32
    %c0_i32_1 = arith.constant 0 : i32
    return %arg0, %arg1, %c0_i32, %c0_i32_0 : i32, i32, i32, i32
  }
  func.func @transform_2(%arg0: i32, %arg1: i32) -> (i32, i32) {
    %c0_i32 = arith.constant 0 : i32
    %c0_i32_0 = arith.constant 0 : i32
    %c0_i32_1 = arith.constant 0 : i32
    return %c0_i32, %c0_i32_0 : i32, i32
  }
  func.func @transform_3(%arg0: i32, %arg1: i32) -> (i32, i32, i32) {
    %c0_i32 = arith.constant 0 : i32
    %c0_i32_0 = arith.constant 0 : i32
    %c0_i32_1 = arith.constant 0 : i32
    %c0_i32_2 = arith.constant 0 : i32
    return %c0_i32, %c0_i32_0, %c0_i32_1 : i32, i32, i32
  }
  func.func @transform_4(%arg0: i32, %arg1: i32) -> (i32, i32) {
    %c0_i32 = arith.constant 0 : i32
    %c0_i32_0 = arith.constant 0 : i32
    %c0_i32_1 = arith.constant 0 : i32
    return %c0_i32, %c0_i32_0 : i32, i32
  }
  func.func @transform_5(%arg0: i32, %arg1: i32) -> (i32, i32) {
    %c0_i32 = arith.constant 0 : i32
    %c0_i32_0 = arith.constant 0 : i32
    %c0_i32_1 = arith.constant 0 : i32
    return %c0_i32, %c0_i32_0 : i32, i32
  }
  func.func @transform_6(%arg0: i32, %arg1: i32) -> (i32, i32) {
    %c0_i32 = arith.constant 0 : i32
    %c0_i32_0 = arith.constant 0 : i32
    %c0_i32_1 = arith.constant 0 : i32
    return %c0_i32, %c0_i32_0 : i32, i32
  }
  func.func @transform_7(%arg0: i32, %arg1: i32) -> (i32, i32) {
    %c0_i32 = arith.constant 0 : i32
    %c0_i32_0 = arith.constant 0 : i32
    %c0_i32_1 = arith.constant 0 : i32
    return %c0_i32, %c0_i32_0 : i32, i32
  }
  func.func @transform_8(%arg0: i32, %arg1: i32) -> (i32, i32) {
    %c0_i32 = arith.constant 0 : i32
    %c0_i32_0 = arith.constant 0 : i32
    %c0_i32_1 = arith.constant 0 : i32
    return %c0_i32, %c0_i32_0 : i32, i32
  }
  func.func @transform_9(%arg0: i32, %arg1: i32) -> (i32, i32) {
    %c0_i32 = arith.constant 0 : i32
    %c0_i32_0 = arith.constant 0 : i32
    %c0_i32_1 = arith.constant 0 : i32
    return %c0_i32, %c0_i32_0 : i32, i32
  }
  func.func @transform_10(%arg0: i32, %arg1: i32) -> (i32, i32, i32) {
    %c0_i32 = arith.constant 0 : i32
    %c0_i32_0 = arith.constant 0 : i32
    return %arg0, %arg1, %c0_i32 : i32, i32, i32
  }
}

</mosaic_0001>

<bundles_post_ra>
// kernel: trd_max_pallas.1
= control target key start
LH: loop header
LB: loop body
LE: loop exit
PB: predicated region body
PF: predicated region fallthrough
CT: control target
= control target key end

     0   :  { %s1554_s13 = smov 0   ;;  %s1556_s14 = smov 0   ;;  %s1928_s0 = inlined_call_operand.vmem [shape: bf16[2,64,16], index: 0, kind: input, shape index: {}]   ;;  %s1929_s1 = inlined_call_operand.vmem [shape: bf16[2,2,8,16], index: 1, kind: input, shape index: {}]   ;;  %s1930_s2 = inlined_call_operand.vmem [shape: bf16[16,1024], index: 2, kind: input, shape index: {}]   ;;  %s1931_s3 = inlined_call_operand.vmem [shape: bf16[2,16,8], index: 3, kind: input, shape index: {}]   ;;  %s1932_s4 = inlined_call_operand.vmem [shape: f32[1,8], index: 4, kind: input, shape index: {}]   ;;  %s1933_s5 = inlined_call_operand.vmem [shape: f32[1,8], index: 5, kind: input, shape index: {}]   ;;  %s1934_s6 = inlined_call_operand.vmem [shape: bf16[8,8], index: 6, kind: input, shape index: {}]   ;;  %s1935_s7 = inlined_call_operand.vmem [shape: f32[1,8], index: 7, kind: input, shape index: {}]   ;;  %s1936_s8 = inlined_call_operand.vmem [shape: bf16[8,8], index: 8, kind: input, shape index: {}]   ;;  %s1937_s9 = inlined_call_operand.vmem [shape: f32[1,8], index: 9, kind: input, shape index: {}]   ;;  %s1938_s10 = inlined_call_operand.vmem [shape: bf16[2,64,8], index: 10, kind: output, shape index: {}]  }
   0x1   :  { %s1558_s15 = smov 0   ;;  %s1560_s16 = smov 0  }
   0x2   :  { %s1562_s17 = smov 0  }
   0x3 LB: > { %s29_s18 = sadd.s32 1, %s1489_s15  ;;  %s32_s19 = sadd.s32 1, %s1493_s16  ;;  %s1497_s17 = sphi %s1562_s17, %s20_s17   ;;  %s1493_s16 = sphi %s1560_s16, %s1946_s16   ;;  %s1489_s15 = sphi %s1558_s15, %s1945_s15   ;;  %s1485_s14 = sphi %s1556_s14, %s1944_s14   ;;  %s1481_s13 = sphi %s1554_s13, %s1943_s13  }
   0x4   : > { %p30_p0 = scmp.ge.s32.totalorder %s29_s18, 2  ;;  %p1208_p1 = scmp.ge.s32.totalorder %s1497_s17, 1 }
   0x5   : > { %p348_p2 = scmp.lt.s32.totalorder %s1497_s17, 5 }
   0x6   : > { %s1948_s18 = smov (%p30_p0, %s29_s18), 0  ;;  %s1950_s19 = smov (!%p30_p0, %s32_s19), %s1493_s16 }
   0x7   : > { %p349_p3 = pnand %p1208_p1, %p348_p2  ;;  %p34_p4 = scmp.ge.s32.totalorder %s1950_s19, 2 }
   0x8   : > { %s1209_s23 = sshll.u32 (!%p349_p3), %s1481_s13, 2  ;;  %p403_p5 = scmp.lt.s32.totalorder (!%p349_p3), %s1485_s14, 1 }
   0x9   : > { %s1952_s19 = smov (%p34_p4, %s1950_s19), 0  ;;  %352 = sbr.rel (%p349_p3) target bundleno = 438 (0x1b6), region = 60 }
   0xa   : > { %p405_p6 = scmp.lt.s32.totalorder (!%p349_p3), %s1209_s23, 7  ;;  %p414_p7 = scmp.lt.s32.totalorder (!%p349_p3), %s1481_s13, 1 }
   0xe   : > { %v1227_v0 = vld [vmem:[%s1930_s2] sm:$0xf]  ;;  %v1293_v2 = vld [vmem:[%s1930_s2 + $0x4] sm:$0xf]  ;;  %v1235_v5 = vld [vmem:[%s1930_s2 + $0x8] sm:$0xf]  ;;  %v697_v35 = vlaneseq }
   0xf   : > { %v1297_v1 = vld [vmem:[%s1930_s2 + $0x1c] sm:$0xf0]  ;;  %v1229_v4 = vld [vmem:[%s1930_s2 + $0x20] sm:$0xf0]  ;;  %v1298_v6 = vld [vmem:[%s1930_s2 + $0x24] sm:$0xf0] }
  0x10   : > { %v1228_v3 = vor.u32 %v1297_v1, %v1227_v0  ;;  %v1232_v7 = vor.u32 %v1293_v2, %v1229_v4  ;;  %v1236_v8 = vor.u32 %v1298_v6, %v1235_v5  ;;  %v1294_v9 = vld [vmem:[%s1930_s2 + $0xc] sm:$0xf]  ;;  %v1243_v12 = vld [vmem:[%s1930_s2 + $0x10] sm:$0xf]  ;;  %s1954_s14 = smov (!%p403_p5, %s1485_s14), 1  ;;  %s1956_s23 = smov (!%p405_p6, %s1209_s23), 7 }
  0x11   : > { %v1237_v10 = vld [vmem:[%s1930_s2 + $0x28] sm:$0xf0]  ;;  %v1299_v13 = vld [vmem:[%s1930_s2 + $0x2c] sm:$0xf0]  ;;  %v1295_v15 = vld [vmem:[%s1930_s2 + $0x14] sm:$0xf] }
  0x12   : > { %508 = vmatpush.bf16.msra.mxu0 %v1228_v3  ;;  %v1240_v11 = vor.u32 %v1294_v9, %v1237_v10  ;;  %527 = vmatpush.bf16.msra.mxu1 %v1232_v7  ;;  %v1244_v14 = vor.u32 %v1299_v13, %v1243_v12  ;;  %v1245_v16 = vld [vmem:[%s1930_s2 + $0x30] sm:$0xf0]  ;;  %v1251_v18 = vld [vmem:[%s1930_s2 + $0x18] sm:$0xf]  ;;  %s1210_s24 = sshll.u32 %s1954_s14, 3  ;;  %vm494_vm0 = vcmask 130048  }
  0x13   : > { %545 = vmatpush.bf16.msra.mxu2 %v1236_v8  ;;  %v1248_v17 = vor.u32 %v1295_v15, %v1245_v16  ;;  %v1300_v19 = vld [vmem:[%s1930_s2 + $0x34] sm:$0xf0]  ;;  %v1296_v21 = vld [vmem:[%s1930_s2 + $0x1c] sm:$0xf]  ;;  %s1642_s29 = sadd.s32 %s1210_s24, %s1956_s23  ;;  %v1301_v25 = vld [vmem:[%s1931_s3] sm:$0xff]  ;;  %s1958_s13 = smov (!%p414_p7, %s1481_s13), 1 }
  0x14   : > { %564 = vmatpush.bf16.msra.mxu3 %v1240_v11  ;;  %v1252_v20 = vor.u32 %v1300_v19, %v1251_v18  ;;  %v1253_v22 = vld [vmem:[%s1930_s2 + $0x38] sm:$0xf0]  ;;  %s1211_s30 = sshll.u32 %s1642_s29, 2  ;;  %v1302_v26 = vld [vmem:[%s1931_s3 + $0x8] sm:$0xff]  ;;  %s1212_s25 = sshll.u32 %s1954_s14, 1  ;;  %v1690_v36 = vshrl.u32 %v697_v35, 7 }
  0x15   : > { %v1256_v23 = vor.u32 %v1296_v21, %v1253_v22  ;;  %s410_s20 = scalar_lea.vmem %s1928_s0, %s1211_s30  ;;  %s417_s26 = sadd.s32 %s1212_s25, %s1958_s13  ;;  %v1712_v58 = vld [vmem:[%s1932_s4] ss:$0 sm:$0xff]  ;;  %vm977_vm6 = vcmask 1043456   ;;  %vm970_vm7 = vcmask 64512   ;;  %vm1091_vm8 = vcmask 60416  }
  0x16   : > { %582 = vmatpush.bf16.msrb.mxu0 %v1244_v14  ;;  %601 = vmatpush.bf16.msrb.mxu1 %v1248_v17  ;;  %v1291_v24 = vld [vmem:[%s410_s20] sm:$0xff]  ;;  %v1292_v27 = vld [vmem:[%s410_s20 + $0x8] sm:$0xff]  ;;  %s1213_s27 = sshll.u32 %s417_s26, 2  ;;  %v700_v39 = vadd.s32 16, %v1690_v36  ;;  %vm762_vm1 = vcmp.lt.s32.totalorder %v1690_v36, 1  ;;  %v701_v54 = vadd.s32 24, %v1690_v36  ;;  %s1903_s14 = scalar_lea.vmem %s1938_s10, %s1211_s30 }
  0x17   : > { %620 = vmatpush.bf16.msrb.mxu2 %v1252_v20  ;;  %1257 = vmatmul.msk.bf16.vlgmr.msra.gmra.mxu0 %vm494_vm0, %v1291_v24  ;;  %s419_s12 = scalar_lea.vmem %s1929_s1, %s1213_s27  ;;  %v1717_v59 = vld [vmem:[%s1933_s5] ss:$0 sm:$0xff] }
  0x18   : > { %639 = vmatpush.bf16.msrb.mxu3 %v1256_v23  ;;  %1259 = vmatmul.msk.bf16.vlgmr.msra.gmra.mxu1 %vm494_vm0, %v1291_v24  ;;  %v435_v28 = vld [vmem:[%s419_s12] sm:$0xf]  ;;  %v720_v44 = vand.u32 7, %v700_v39  ;;  %v727_v61 = vand.u32 7, %v701_v54 }
  0x19   : > { %1261 = vmatmul.msk.bf16.vlgmr.msra.gmra.mxu2 %vm494_vm0, %v1291_v24  ;;  %1263 = vmatmul.msk.bf16.vlgmr.msra.gmra.mxu3 %vm494_vm0, %v1291_v24 }
  0x1a   : > { %669 = vmatpush.bf16.msra.mxu0 %v1301_v25  ;;  %691 = vmatpush.bf16.msra.mxu1 %v1302_v26  ;;  %vm752_vm2 = vcmp.eq.s32.totalorder %v720_v44, 0  ;;  %vm753_vm3 = vcmp.eq.s32.totalorder %v727_v61, 0  ;;  %v699_v61 = vadd.s32 8, %v1690_v36 }
  0x27   : > { %1258 = vmatmul.msk.bf16.gmra.mxu0 %vm494_vm0, %v1292_v27 }
  0x28   : > { %1260 = vmatmul.msk.bf16.gmra.mxu1 %vm494_vm0, %v1292_v27 }
  0x29   : > { %1262 = vmatmul.msk.bf16.gmra.mxu2 %vm494_vm0, %v1292_v27  ;;  %1264 = vmatmul.msk.bf16.gmra.mxu3 %vm494_vm0, %v1292_v27 }
  0x37   : > { %1265 = vmatmul.msk.bf16.vlgmr.msrb.gmra.mxu0 %vm494_vm0, %v1291_v24 }
  0x38   : > { %1267 = vmatmul.msk.bf16.vlgmr.msrb.gmra.mxu1 %vm494_vm0, %v1291_v24 }
  0x39   : > { %1269 = vmatmul.msk.bf16.vlgmr.msrb.gmra.mxu2 %vm494_vm0, %v1291_v24  ;;  %1271 = vmatmul.msk.bf16.vlgmr.msrb.gmra.mxu3 %vm494_vm0, %v1291_v24 }
  0x47   : > { %1266 = vmatmul.msk.bf16.gmra.mxu0 %vm494_vm0, %v1292_v27 }
  0x48   : > { %1268 = vmatmul.msk.bf16.gmra.mxu1 %vm494_vm0, %v1292_v27 }
  0x49   : > { %1270 = vmatmul.msk.bf16.gmra.mxu2 %vm494_vm0, %v1292_v27  ;;  %1272 = vmatmul.msk.bf16.gmra.mxu3 %vm494_vm0, %v1292_v27 }
  0x57   : > { %1277 = vmatmul.msk.bf16.vlgmr.msra.gmra.mxu0 %vm494_vm0, %v435_v28 }
  0x58   : > { %1284 = vmatmul.msk.bf16.vlgmr.msra.gmra.mxu1 %vm494_vm0, %v435_v28 }
  0x94   : > { %v1680_v29 = vpop.f32.mrf.mxu0 }
  0x95   : > { %v1682_v30 = vpop.f32.mrf.mxu1 }
  0x9c   : > { %v1684_v31 = vpop.f32.mrf.mxu2  ;;  %v1686_v32 = vpop.f32.mrf.mxu3 }
  0x9d   : > { %v1688_v33 = vpop.f32.mrf.mxu0  ;;  %v531_v34 = vpop.f32.mrf.mxu1  ;;  %v784_v43 = vrot.slane %v1686_v32, 7 }
  0xa4   : > { %v1692_v37 = vpop.f32.mrf.mxu2  ;;  %v568_v38 = vpop.f32.mrf.mxu3 }
  0xa5   : > { %v515_v40 = vpop.f32.mrf.mxu0  ;;  %v534_v41 = vpop.f32.mrf.mxu1  ;;  %v785_v45 = vrot.slane %v568_v38, 7  ;;  %v759_v48 = vrot.slane %v1692_v37, 7 }
  0xa6   : > { %v756_v42 = vadd.f32 %v531_v34, %v515_v40 }
  0xa7   : > { %v788_v49 = vsel %vm762_vm1, %v784_v43, %v785_v45 }
  0xa8   : > { %v793_v55 = vsel %vm752_vm2, 0.0, %v788_v49 }
  0xac   : > { %v552_v46 = vpop.f32.mrf.mxu2  ;;  %v1697_v47 = vpop.f32.mrf.mxu3 }
  0xad   : > { %v760_v50 = vrot.slane %v552_v46, 7  ;;  %v517_v51 = vpop.f32.mrf.mxu0  ;;  %v536_v52 = vpop.f32.mrf.mxu1  ;;  %v786_v62 = vrot.slane %v1697_v47, 7 }
  0xae   : > { %v757_v8 = vadd.f32 %v534_v41, %v517_v51 }
  0xaf   : > { %v764_v53 = vsel %vm762_vm1, %v759_v48, %v760_v50  ;;  %v787_v7 = vsel %vm762_vm1, %v785_v45, %v786_v62 }
  0xb0   : > { %v777_v56 = vsel %vm752_vm2, 0.0, %v764_v53  ;;  %v794_v15 = vsel %vm753_vm3, 0.0, %v787_v7 }
  0xb1   : > { %v781_v57 = vadd.f32 %v777_v56, %v756_v42 }
  0xb3   : > { %v797_v60 = vadd.f32 %v793_v55, %v781_v57 }
  0xb4   : > { %v1720_v63 = vpop.f32.mrf.mxu2  ;;  %v573_v0 = vpop.f32.mrf.mxu3 }
  0xb5   : > { %v761_v1 = vrot.slane %v1720_v63, 7  ;;  %v584_v2 = vpop.f32.mrf.mxu0  ;;  %v603_v3 = vpop.f32.mrf.mxu1  ;;  %v1724_v4 = vadd.f32 %v1712_v58, %v797_v60 }
  0xb6   : > { %v1727_v5 = vadd.f32 %v1717_v59, %v584_v2  ;;  %v1730_v6 = vadd.f32 %v1717_v59, %v603_v3 }
  0xb7   : > { %v763_v9 = vsel %vm762_vm1, %v760_v50, %v761_v1  ;;  %v809_v14 = vsub.f32 0.0, %v1724_v4 }
  0xb8   : > { %v778_v10 = vsel %vm753_vm3, 0.0, %v763_v9  ;;  %v839_v11 = vsub.f32 0.0, %v1727_v5  ;;  %v867_v12 = vsub.f32 0.0, %v1730_v6 }
  0xb9   : > { %v782_v13 = vadd.f32 %v778_v10, %v757_v8  ;;  %v815_v25 = vmul.f32 1.442695, %v809_v14  ;;  %v713_v14 = vand.u32 7, %v699_v61 }
  0xba   : > { %v843_v16 = vmul.f32 1.442695, %v839_v11  ;;  %v871_v17 = vmul.f32 1.442695, %v867_v12 }
  0xbb   : > { %v798_v18 = vadd.f32 %v794_v15, %v782_v13  ;;  %v758_v13 = vrot.slane %v1684_v31, 7  ;;  %vm1801_vm4 = vcmp.eq.s32.totalorder %v713_v14, 0 }
  0xbc   : > { %1347 = vpow2.f32 %v843_v16  ;;  %v622_v19 = vpop.f32.mrf.mxu2  ;;  %v641_v20 = vpop.f32.mrf.mxu3 }
  0xbd   : > { %1349 = vpow2.f32 %v871_v17  ;;  %v1744_v21 = vadd.f32 %v1717_v59, %v622_v19  ;;  %v1747_v22 = vadd.f32 %v1717_v59, %v641_v20  ;;  %v586_v23 = vpop.f32.mrf.mxu0  ;;  %v605_v24 = vpop.f32.mrf.mxu1  ;;  %v1758_v38 = vadd.f32 %v1712_v58, %v798_v18 }
  0xbe   : > { %v1752_v28 = vadd.f32 %v1717_v59, %v586_v23  ;;  %v1755_v34 = vadd.f32 %v1717_v59, %v605_v24  ;;  %1351 = vpow2.f32 %v815_v25  ;;  %v766_v37 = vsel %vm762_vm1, %v761_v1, %v758_v13 }
  0xbf   : > { %v899_v26 = vsub.f32 0.0, %v1744_v21  ;;  %v931_v27 = vsub.f32 0.0, %v1747_v22  ;;  %v810_v53 = vsub.f32 0.0, %v1758_v38 }
  0xc0   : > { %v840_v42 = vsub.f32 0.0, %v1752_v28  ;;  %v868_v44 = vsub.f32 0.0, %v1755_v34 }
  0xc1   : > { %v903_v35 = vmul.f32 1.442695, %v899_v26  ;;  %v935_v41 = vmul.f32 1.442695, %v931_v27  ;;  %v817_v7 = vmul.f32 1.442695, %v810_v53 }
  0xc2   : > { %v1348_v39 = vpop.eup %1347  ;;  %v845_v60 = vmul.f32 1.442695, %v840_v42  ;;  %v873_v0 = vmul.f32 1.442695, %v868_v44 }
  0xc3   : > { %v1350_v40 = vpop.eup %1349  ;;  %1353 = vpow2.f32 %v903_v35  ;;  %v851_v49 = vadd.f32 1.0, %v1348_v39 }
  0xc4   : > { %v624_v45 = vpop.f32.mrf.mxu2  ;;  %v643_v46 = vpop.f32.mrf.mxu3  ;;  %v879_v54 = vadd.f32 1.0, %v1350_v40  ;;  %1355 = vpow2.f32 %v935_v41  ;;  %v706_v41 = vand.u32 7, %v1690_v36 }
  0xc5   : > { %v1763_v50 = vadd.f32 %v1717_v59, %v624_v45  ;;  %v589_v51 = vpop.f32.mrf.mxu0  ;;  %v608_v52 = vpop.f32.mrf.mxu1  ;;  %1357 = vrcp.f32 %v851_v49  ;;  %v1777_v11 = vadd.f32 %v1717_v59, %v643_v46 }
  0xc6   : > { %v1767_v55 = vadd.f32 %v1717_v59, %v589_v51  ;;  %v1770_v56 = vadd.f32 %v1717_v59, %v608_v52  ;;  %v1352_v57 = vpop.eup %1351  ;;  %1359 = vrcp.f32 %v879_v54  ;;  %vm1812_vm5 = vcmp.eq.s32.totalorder %v706_v41, 0 }
  0xc7   : > { %v900_v2 = vsub.f32 0.0, %v1763_v50  ;;  %v821_v10 = vadd.f32 1.0, %v1352_v57  ;;  %1361 = vpow2.f32 %v845_v60  ;;  %v932_v39 = vsub.f32 0.0, %v1777_v11 }
  0xc8   : > { %v841_v3 = vsub.f32 0.0, %v1767_v55  ;;  %v869_v9 = vsub.f32 0.0, %v1770_v56  ;;  %1363 = vpow2.f32 %v873_v0  ;;  %v765_v57 = vsel %vm762_vm1, %v758_v13, %v759_v48 }
  0xc9   : > { %v1354_v8 = vpop.eup %1353  ;;  %v905_v15 = vmul.f32 1.442695, %v900_v2  ;;  %1365 = vpow2.f32 %v817_v7  ;;  %v937_v2 = vmul.f32 1.442695, %v932_v39 }
  0xca   : > { %v847_v12 = vmul.f32 1.442695, %v841_v3  ;;  %v1356_v18 = vpop.eup %1355  ;;  %v911_v19 = vadd.f32 1.0, %v1354_v8  ;;  %v875_v26 = vmul.f32 1.442695, %v869_v9  ;;  %1367 = vrcp.f32 %v821_v10 }
  0xcb   : > { %v1792_v35 = vpop.eup %1357  ;;  %v943_v44 = vadd.f32 1.0, %v1356_v18 }
  0xcc   : > { %v627_v16 = vpop.f32.mrf.mxu2  ;;  %v646_v17 = vpop.f32.mrf.mxu3  ;;  %1369 = vpow2.f32 %v847_v12  ;;  %v776_v12 = vsel %vm1801_vm4, 0.0, %v765_v57  ;;  %v965_v57 = vld [vmem:[%s1934_s6] sm:$0xf] }
  0xcd   : > { %v1781_v20 = vadd.f32 %v1717_v59, %v627_v16  ;;  %v1784_v23 = vadd.f32 %v1717_v59, %v646_v17  ;;  %v591_v24 = vpop.f32.mrf.mxu0  ;;  %v610_v25 = vpop.f32.mrf.mxu1  ;;  %1371 = vpow2.f32 %v905_v15  ;;  %v979_v10 = vsel %vm977_vm6, %v965_v57, 0 }
  0xce   : > { %v1787_v27 = vadd.f32 %v1717_v59, %v591_v24  ;;  %v1790_v31 = vadd.f32 %v1717_v59, %v610_v25  ;;  %v1797_v42 = vpop.eup %1359  ;;  %1373 = vrcp.f32 %v911_v19  ;;  %988 = vmatpush.bf16.msra.mxu2 %v979_v10 }
  0xcf   : > { %v901_v40 = vsub.f32 0.0, %v1781_v20  ;;  %v933_v45 = vsub.f32 0.0, %v1784_v23  ;;  %v1362_v49 = vpop.eup %1361  ;;  %1375 = vpow2.f32 %v875_v26  ;;  %v775_v26 = vsel %vm1812_vm5, 0.0, %v766_v37 }
  0xd0   : > { %v842_v46 = vsub.f32 0.0, %v1787_v27  ;;  %v870_v53 = vsub.f32 0.0, %v1790_v31  ;;  %v1364_v54 = vpop.eup %1363  ;;  %v852_v7 = vadd.f32 1.0, %v1362_v49 }
  0xd1   : > { %v907_v52 = vmul.f32 1.442695, %v901_v40  ;;  %v939_v60 = vmul.f32 1.442695, %v933_v45  ;;  %v1366_v0 = vpop.eup %1365  ;;  %v880_v19 = vadd.f32 1.0, %v1364_v54  ;;  %v755_v40 = vadd.f32 %v1682_v30, %v1688_v33 }
  0xd2   : > { %v849_v61 = vmul.f32 1.442695, %v842_v46  ;;  %v1810_v3 = vpop.eup %1367  ;;  %v877_v14 = vmul.f32 1.442695, %v870_v53 }
  0xd3   : > { %1377 = vpow2.f32 %v907_v52  ;;  %v1370_v48 = vpop.eup %1369  ;;  %v780_v52 = vadd.f32 %v776_v12, %v755_v40  ;;  %v829_v57 = vmul.f32 %v1810_v3, %v1724_v4 }
  0xd4   : > { %1379 = vrcp.f32 %v943_v44  ;;  %v629_v8 = vpop.f32.mrf.mxu2  ;;  %v648_v9 = vpop.f32.mrf.mxu3  ;;  %v853_v13 = vadd.f32 1.0, %v1370_v48 }
  0xd5   : > { %1381 = vpow2.f32 %v939_v60  ;;  %v1823_v15 = vadd.f32 %v1717_v59, %v629_v8  ;;  %v671_v16 = vpop.f32.mrf.mxu0  ;;  %v693_v17 = vpop.f32.mrf.mxu1  ;;  %v1826_v24 = vadd.f32 %v1717_v59, %v648_v9  ;;  %v822_v9 = vadd.f32 1.0, %v1366_v0 }
  0xd6   : > { %v1372_v18 = vpop.eup %1371  ;;  %1383 = vpow2.f32 %v849_v61  ;;  %v754_v63 = vadd.f32 %v671_v16, %v1680_v29  ;;  %v783_v46 = vrot.slane %v693_v17, 7 }
  0xd7   : > { %v1829_v1 = vpop.eup %1373  ;;  %1385 = vpow2.f32 %v937_v2  ;;  %v902_v25 = vsub.f32 0.0, %v1823_v15  ;;  %v934_v41 = vsub.f32 0.0, %v1826_v24 }
  0xd8   : > { %v1376_v39 = vpop.eup %1375  ;;  %1387 = vrcp.f32 %v852_v7  ;;  %v779_v59 = vadd.f32 %v775_v26, %v754_v63  ;;  %v789_v30 = vsel %vm762_vm1, %v783_v46, %v784_v43  ;;  %v790_v33 = vsel %vm762_vm1, %v786_v62, %v783_v46  ;;  %v1026_v43 = vld [vmem:[%s1936_s8] sm:$0xf] }
  0xd9   : > { %v1378_v44 = vpop.eup %1377  ;;  %v881_v45 = vadd.f32 1.0, %v1376_v39  ;;  %1389 = vpow2.f32 %v877_v14  ;;  %v909_v29 = vmul.f32 1.442695, %v902_v25  ;;  %v941_v61 = vmul.f32 1.442695, %v934_v41 }
  0xda   : > { %v1837_v49 = vpop.eup %1379  ;;  %1391 = vrcp.f32 %v880_v19  ;;  %v913_v53 = vadd.f32 1.0, %v1378_v44  ;;  %v791_v2 = vsel %vm1812_vm5, 0.0, %v790_v33  ;;  %v792_v32 = vsel %vm1801_vm4, 0.0, %v789_v30 }
  0xdb   : > { %v1382_v54 = vpop.eup %1381  ;;  %1393 = vrcp.f32 %v853_v13  ;;  %v795_v62 = vadd.f32 %v791_v2, %v779_v59  ;;  %v796_v48 = vadd.f32 %v792_v32, %v780_v52  ;;  %v1038_v16 = vsel %vm977_vm6, %v1026_v43, 0 }
  0xdc   : > { %v1384_v60 = vpop.eup %1383  ;;  %1395 = vrcp.f32 %v881_v45  ;;  %v945_v14 = vadd.f32 1.0, %v1382_v54  ;;  %v912_v19 = vadd.f32 1.0, %v1372_v18  ;;  %1047 = vmatpush.bf16.msra.mxu3 %v1038_v16  ;;  %v919_v4 = vmul.f32 %v1829_v1, %v1744_v21 }
  0xdd   : > { %v1386_v36 = vpop.eup %1385  ;;  %v854_v47 = vadd.f32 1.0, %v1384_v60  ;;  %1397 = vpow2.f32 %v909_v29  ;;  %v673_v7 = vpop.f32.mrf.mxu0  ;;  %v1859_v51 = vadd.f32 %v1712_v58, %v795_v62  ;;  %v1863_v0 = vadd.f32 %v1712_v58, %v796_v48 }
  0xde   : > { %v695_v8 = vpop.f32.mrf.mxu1  ;;  %v1388_v37 = vpop.eup %1387  ;;  %1399 = vrcp.f32 %v913_v53  ;;  %v944_v30 = vadd.f32 1.0, %v1386_v36  ;;  %v859_v36 = vmul.f32 %v1792_v35, %v1727_v5 }
  0xdf   : > { %v1390_v12 = vpop.eup %1389  ;;  %1401 = vrcp.f32 %v854_v47  ;;  %v807_v25 = vsub.f32 0.0, %v1859_v51  ;;  %v808_v39 = vsub.f32 0.0, %v1863_v0  ;;  %v860_v7 = vmul.f32 %v1388_v37, %v1752_v28 }
  0xe0   : > { %v1392_v17 = vpop.eup %1391  ;;  %v882_v63 = vadd.f32 1.0, %v1390_v12  ;;  %1403 = vpow2.f32 %v941_v61  ;;  %v951_v28 = vmul.f32 %v1837_v49, %v1747_v22 }
  0xe1   : > { %v1394_v13 = vpop.eup %1393  ;;  %1405 = vrcp.f32 %v822_v9  ;;  %v811_v41 = vmul.f32 1.442695, %v807_v25  ;;  %v813_v44 = vmul.f32 1.442695, %v808_v39  ;;  %v888_v8 = vmul.f32 %v1392_v17, %v1755_v34 }
  0xe2   : > { %v1396_v26 = vpop.eup %1395  ;;  %1407 = vrcp.f32 %v882_v63  ;;  %v861_v29 = vmul.f32 %v1394_v13, %v1767_v55 }
  0xe3   : > { %v1398_v40 = vpop.eup %1397  ;;  %1409 = vrcp.f32 %v945_v14  ;;  %v889_v46 = vmul.f32 %v1396_v26, %v1770_v56  ;;  %v892_v37 = vmin.f32 %v860_v7, %v888_v8 }
  0xe4   : > { %v1400_v59 = vpop.eup %1399  ;;  %1411 = vrcp.f32 %v912_v19  ;;  %v914_v18 = vadd.f32 1.0, %v1398_v40 }
  0xe5   : > { %v1402_v45 = vpop.eup %1401  ;;  %1413 = vpow2.f32 %v811_v41  ;;  %v921_v33 = vmul.f32 %v1400_v59, %v1781_v20  ;;  %v893_v32 = vmin.f32 %v861_v29, %v889_v46  ;;  %v887_v20 = vmul.f32 %v1797_v42, %v1730_v6 }
  0xe6   : > { %v1404_v58 = vpop.eup %1403  ;;  %1415 = vrcp.f32 %v914_v18  ;;  %v862_v2 = vmul.f32 %v1402_v45, %v1787_v27 }
  0xe7   : > { %v1406_v52 = vpop.eup %1405  ;;  %v946_v53 = vadd.f32 1.0, %v1404_v58  ;;  %1417 = vpow2.f32 %v813_v44  ;;  %v925_v3 = vmin.f32 %v893_v32, %v921_v33  ;;  %v891_v42 = vmin.f32 %v859_v36, %v887_v20 }
  0xe8   : > { %v1408_v54 = vpop.eup %1407  ;;  %v830_v60 = vmul.f32 %v1406_v52, %v1758_v38 }
  0xe9   : > { %v1410_v61 = vpop.eup %1409  ;;  %v890_v55 = vmul.f32 %v1408_v54, %v1790_v31  ;;  %1419 = vrcp.f32 %v946_v53 }
  0xea   : > { %v1412_v56 = vpop.eup %1411  ;;  %v964_v43 = vpack.c.bf16 %v830_v60, %v829_v57  ;;  %1421 = vrcp.f32 %v944_v30  ;;  %v953_v27 = vmul.f32 %v1410_v61, %v1784_v23  ;;  %v923_v23 = vmin.f32 %v891_v42, %v919_v4 }
  0xeb   : > { %v1414_v47 = vpop.eup %1413  ;;  %v894_v9 = vmin.f32 %v862_v2, %v890_v55  ;;  %v920_v21 = vmul.f32 %v1412_v56, %v1763_v50 }
  0xec   : > { %v1416_v38 = vpop.eup %1415  ;;  %v819_v31 = vadd.f32 1.0, %v1414_v47  ;;  %v957_v48 = vmin.f32 %v925_v3, %v953_v27  ;;  %v955_v19 = vmin.f32 %v923_v23, %v951_v28 }
  0xed   : > { %v1418_v62 = vpop.eup %1417  ;;  %v922_v5 = vmul.f32 %v1416_v38, %v1823_v15  ;;  %v924_v14 = vmin.f32 %v892_v37, %v920_v21 }
  0xee   : > { %v820_v35 = vadd.f32 1.0, %v1418_v62  ;;  %1423 = vrcp.f32 %v819_v31  ;;  %v961_v16 = vsub.f32 %v829_v57, %v957_v48 }
  0xef   : > { %v1420_v6 = vpop.eup %1419  ;;  %v926_v1 = vmin.f32 %v894_v9, %v922_v5 }
  0xf0   : > { %v954_v10 = vmul.f32 %v1420_v6, %v1826_v24  ;;  %1425 = vrcp.f32 %v820_v35  ;;  %v1422_v34 = vpop.eup %1421 }
  0xf1   : > { %v952_v63 = vmul.f32 %v1422_v34, %v1777_v11  ;;  %v1345_v11 = vld [vmem:[%s1935_s7] ss:$0 sm:$0xff] }
  0xf2   : > { %v958_v12 = vmin.f32 %v926_v1, %v954_v10 }
  0xf3   : > { %v956_v24 = vmin.f32 %v924_v14, %v952_v63 }
  0xf4   : > { %v1424_v15 = vpop.eup %1423  ;;  %v962_v17 = vsub.f32 %v830_v60, %v958_v12 }
  0xf5   : > { %v827_v50 = vmul.f32 %v1424_v15, %v1859_v51  ;;  %v1346_v51 = vld [vmem:[%s1937_s9] ss:$0 sm:$0xff] }
  0xf6   : > { %v1426_v13 = vpop.eup %1425  ;;  %v1025_v25 = vpack.c.bf16 %v962_v17, %v961_v16 }
  0xf7   : > { %v828_v26 = vmul.f32 %v1426_v13, %v1863_v0  ;;  %v959_v39 = vsub.f32 %v827_v50, %v955_v19 }
  0xf9   : > { %v960_v22 = vsub.f32 %v828_v26, %v956_v24  ;;  %v963_v49 = vpack.c.bf16 %v828_v26, %v827_v50 }
  0xfb   : > { %1285 = vmatmul.msk.bf16.vlgmr.msra.gmra.mxu2 %vm970_vm7, %v963_v49  ;;  %v1024_v40 = vpack.c.bf16 %v960_v22, %v959_v39 }
  0xfd   : > { %1287 = vmatmul.msk.bf16.vlgmr.msra.gmra.mxu3 %vm970_vm7, %v1024_v40 }
 0x10b   : > { %1286 = vmatmul.msk.bf16.gmra.mxu2 %vm970_vm7, %v964_v43 }
 0x10d   : > { %1288 = vmatmul.msk.bf16.gmra.mxu3 %vm970_vm7, %v1025_v25 }
 0x17e   : > { %v990_v41 = vpop.f32.mrf.mxu2 }
 0x17f   : > { %v991_v59 = vadd.f32 %v1345_v11, %v990_v41 }
 0x180   : > { %v1049_v0 = vpop.f32.mrf.mxu3 }
 0x181   : > { %v1000_v18 = vsub.f32 0.0, %v991_v59  ;;  %v1050_v44 = vadd.f32 %v1346_v51, %v1049_v0 }
 0x183   : > { %v1004_v45 = vmul.f32 1.442695, %v1000_v18  ;;  %v1059_v58 = vsub.f32 0.0, %v1050_v44 }
 0x185   : > { %1427 = vpow2.f32 %v1004_v45  ;;  %v1063_v29 = vmul.f32 1.442695, %v1059_v58 }
 0x186   : > { %v992_v46 = vpop.f32.mrf.mxu2 }
 0x187   : > { %1429 = vpow2.f32 %v1063_v29  ;;  %v993_v52 = vadd.f32 %v1345_v11, %v992_v46 }
 0x188   : > { %v1051_v53 = vpop.f32.mrf.mxu3 }
 0x189   : > { %v1001_v54 = vsub.f32 0.0, %v993_v52  ;;  %v1052_v30 = vadd.f32 %v1346_v51, %v1051_v53 }
 0x18b   : > { %v1428_v33 = vpop.eup %1427  ;;  %v1006_v57 = vmul.f32 1.442695, %v1001_v54  ;;  %v1060_v60 = vsub.f32 0.0, %v1052_v30 }
 0x18c   : > { %v1012_v61 = vadd.f32 1.0, %v1428_v33 }
 0x18d   : > { %v1430_v2 = vpop.eup %1429  ;;  %1431 = vpow2.f32 %v1006_v57  ;;  %v1065_v55 = vmul.f32 1.442695, %v1060_v60 }
 0x18e   : > { %1433 = vrcp.f32 %v1012_v61  ;;  %v1071_v56 = vadd.f32 1.0, %v1430_v2  ;;  %v995_v32 = vpop.f32.mrf.mxu2 }
 0x18f   : > { %1435 = vpow2.f32 %v1065_v55  ;;  %v996_v43 = vadd.f32 %v1345_v11, %v995_v32 }
 0x190   : > { %1437 = vrcp.f32 %v1071_v56  ;;  %v1054_v47 = vpop.f32.mrf.mxu3 }
 0x191   : > { %v1002_v36 = vsub.f32 0.0, %v996_v43  ;;  %v1055_v20 = vadd.f32 %v1346_v51, %v1054_v47 }
 0x193   : > { %v1432_v4 = vpop.eup %1431  ;;  %v1008_v38 = vmul.f32 1.442695, %v1002_v36  ;;  %v1061_v3 = vsub.f32 0.0, %v1055_v20 }
 0x194   : > { %v1434_v27 = vpop.eup %1433  ;;  %v1013_v31 = vadd.f32 1.0, %v1432_v4 }
 0x195   : > { %v1436_v62 = vpop.eup %1435  ;;  %1439 = vpow2.f32 %v1008_v38  ;;  %v1067_v7 = vmul.f32 1.442695, %v1061_v3  ;;  %v1020_v35 = vmul.f32 %v1434_v27, %v991_v59 }
 0x196   : > { %v1438_v8 = vpop.eup %1437  ;;  %1441 = vrcp.f32 %v1013_v31  ;;  %v1072_v9 = vadd.f32 1.0, %v1436_v62  ;;  %v997_v5 = vpop.f32.mrf.mxu2 }
 0x197   : > { %v1079_v6 = vmul.f32 %v1438_v8, %v1050_v44  ;;  %1443 = vpow2.f32 %v1067_v7  ;;  %v998_v42 = vadd.f32 %v1345_v11, %v997_v5 }
 0x198   : > { %1445 = vrcp.f32 %v1072_v9  ;;  %v1056_v21 = vpop.f32.mrf.mxu3 }
 0x199   : > { %v1083_v1 = vadd.f32 %v1079_v6, %v1020_v35  ;;  %v1003_v48 = vsub.f32 0.0, %v998_v42  ;;  %v1057_v10 = vadd.f32 %v1346_v51, %v1056_v21 }
 0x19b   : > { %v1440_v23 = vpop.eup %1439  ;;  %v1087_v28 = vpack.c.bf16 %v1083_v1, %v1083_v1  ;;  %v1010_v37 = vmul.f32 1.442695, %v1003_v48  ;;  %v1062_v34 = vsub.f32 0.0, %v1057_v10 }
 0x19c   : > { %v1442_v12 = vpop.eup %1441  ;;  %v1014_v14 = vadd.f32 1.0, %v1440_v23 }
 0x19d   : > { %v1444_v15 = vpop.eup %1443  ;;  %1092 = vst.msk [vmem:[%s1903_s14] sm:$0xf] %vm1091_vm8, %v1087_v28  ;;  %1447 = vpow2.f32 %v1010_v37  ;;  %v1069_v16 = vmul.f32 1.442695, %v1062_v34  ;;  %v1021_v63 = vmul.f32 %v1442_v12, %v993_v52 }
 0x19e   : > { %v1446_v17 = vpop.eup %1445  ;;  %1449 = vrcp.f32 %v1014_v14  ;;  %v1073_v19 = vadd.f32 1.0, %v1444_v15 }
 0x19f   : > { %v1080_v50 = vmul.f32 %v1446_v17, %v1052_v30  ;;  %1451 = vpow2.f32 %v1069_v16 }
 0x1a0   : > { %1453 = vrcp.f32 %v1073_v19 }
 0x1a1   : > { %v1084_v13 = vadd.f32 %v1080_v50, %v1021_v63 }
 0x1a3   : > { %v1448_v25 = vpop.eup %1447  ;;  %v1088_v24 = vpack.c.bf16 %v1084_v13, %v1084_v13 }
 0x1a4   : > { %v1450_v26 = vpop.eup %1449  ;;  %v1015_v39 = vadd.f32 1.0, %v1448_v25 }
 0x1a5   : > { %v1452_v22 = vpop.eup %1451  ;;  %1093 = vst.msk [vmem:[%s1903_s14 + $0x4] sm:$0xf] %vm1091_vm8, %v1088_v24  ;;  %v1022_v11 = vmul.f32 %v1450_v26, %v996_v43 }
 0x1a6   : > { %v1454_v49 = vpop.eup %1453  ;;  %1455 = vrcp.f32 %v1015_v39  ;;  %v1074_v40 = vadd.f32 1.0, %v1452_v22 }
 0x1a7   : > { %v1081_v51 = vmul.f32 %v1454_v49, %v1055_v20 }
 0x1a8   : > { %1457 = vrcp.f32 %v1074_v40 }
 0x1a9   : > { %v1085_v41 = vadd.f32 %v1081_v51, %v1022_v11 }
 0x1ab   : > { %v1089_v59 = vpack.c.bf16 %v1085_v41, %v1085_v41 }
 0x1ac   : > { %v1456_v0 = vpop.eup %1455 }
 0x1ad   : > { %1094 = vst.msk [vmem:[%s1903_s14 + $0x8] sm:$0xf] %vm1091_vm8, %v1089_v59  ;;  %v1023_v44 = vmul.f32 %v1456_v0, %v998_v42 }
 0x1ae   : > { %v1458_v18 = vpop.eup %1457 }
 0x1af   : > { %v1082_v45 = vmul.f32 %v1458_v18, %v1057_v10 }
 0x1b1   : > { %v1086_v58 = vadd.f32 %v1082_v45, %v1023_v44 }
 0x1b3   : > { %v1090_v29 = vpack.c.bf16 %v1086_v58, %v1086_v58 }
 0x1b5   : > { %1095 = vst.msk [vmem:[%s1903_s14 + $0xc] sm:$0xf] %vm1091_vm8, %v1090_v29 }
 0x1b6 PF: > { %s20_s17 = sadd.s32 1, %s1497_s17   ;;  %s1943_s13 = smov %s1489_s15 }
 0x1b7   : > { %p17_p8 = scmp.ge.s32.totalorder %s20_s17, 6   ;;  %s1944_s14 = smov %s1493_s16 }
 0x1b8   : > { %s1945_s15 = smov %s1948_s18  ;;  %s1946_s16 = smov %s1952_s19 }
 0x1b9   :  { %19 = sbr.rel (!%p17_p8) target bundleno = 3 (0x3), region = 94 }

</bundles_post_ra>
